<compile_context>
chip_gen: v7x
topology: tpu7x:2x2x1
jax: 0.10.0
libtpu: 0.0.40
codegen_flags: <defaults>
</compile_context>

<pallas_src>
import itertools
import math

import jax
import jax.numpy as jnp
import numpy as np
from jax import lax
from jax.experimental import pallas as pl
from jax.experimental.pallas import tpu as pltpu


# ------------------------------------------------------------------
# mask construction (plain numpy glue — same logic as torch make_mask)
# ------------------------------------------------------------------
def make_mask_densest(in_features: int, out_features: int) -> np.ndarray:
    mask = np.ones((out_features, in_features), dtype=np.float32)
    mask[0, :] = 1.0
    row_idx = 1
    if out_features == 1:
        return mask
    for nz in range(1, in_features):
        for zeros_in_row in itertools.combinations(range(in_features), nz):
            mask[row_idx, list(zeros_in_row)] = 0.0
            row_idx += 1
            if row_idx >= out_features:
                return mask
    return mask


# ------------------------------------------------------------------
# shape helpers
# ------------------------------------------------------------------
def _round_up(v: int, m: int) -> int:
    return ((v + m - 1) // m) * m


def _pad2d(a, rows: int, cols: int):
    r, c = a.shape
    if r == rows and c == cols:
        return a
    return jnp.pad(a, ((0, rows - r), (0, cols - c)))


def _pick_k_tile(k_p: int) -> int:
    # k_p is always a multiple of 128; pick the biggest of 512/256/128 dividing it.
    for t in (512, 256, 128):
        if k_p % t == 0:
            return t
    return k_p


def _batch_tiling(batch: int):
    # Never let the batch tile become the whole (possibly huge) batch.
    if batch <= 256:
        b_p = _round_up(batch, 16)   # 16 = bf16 sublane-packed tile height
        tb = b_p
    else:
        b_p = _round_up(batch, 256)
        tb = 256
    return b_p, tb


_MM_COMPILER_PARAMS = pltpu.CompilerParams(
    dimension_semantics=("parallel", "parallel", "arbitrary"),
    vmem_limit_bytes=32 * 1024 * 1024,
)


# ------------------------------------------------------------------
# Kernel 1: tiled mask-mix, emits bf16 w_eff (used once at param-prep time)
#   w_eff = weight * mask + (1 - mask) * mask_constant * normal_mask
# ------------------------------------------------------------------
def _mask_mix_kernel(mc_ref, w_ref, m_ref, nm_ref, weff_ref):
    mc = mc_ref[0, 0]                      # SMEM scalar read
    m = m_ref[...]
    w_eff = w_ref[...] * m + (1.0 - m) * mc * nm_ref[...]
    weff_ref[...] = w_eff.astype(weff_ref.dtype)


def masked_weight(weight_p, mask_p, nmask_p, mc):
    out_p, in_p = weight_p.shape
    tn = 256
    tk = _pick_k_tile(in_p)
    grid = (out_p // tn, in_p // tk)
    return pl.pallas_call(
        _mask_mix_kernel,
        out_shape=jax.ShapeDtypeStruct((out_p, in_p), jnp.bfloat16),
        grid=grid,
        in_specs=[
            pl.BlockSpec(memory_space=pltpu.MemorySpace.SMEM),      # mask_constant
            pl.BlockSpec((tn, tk), lambda j, k: (j, k)),            # weight
            pl.BlockSpec((tn, tk), lambda j, k: (j, k)),            # mask
            pl.BlockSpec((tn, tk), lambda j, k: (j, k)),            # normal_mask
        ],
        out_specs=pl.BlockSpec((tn, tk), lambda j, k: (j, k)),
        compiler_params=pltpu.CompilerParams(
            dimension_semantics=("parallel", "parallel"),
            vmem_limit_bytes=32 * 1024 * 1024),
    )(mc, weight_p, mask_p, nmask_p)


# ------------------------------------------------------------------
# Kernel 2 (cached path): y = x @ w_eff.T + bias, K-tiled with accumulator
# ------------------------------------------------------------------
def _linear_cached_kernel(x_ref, w_ref, b_ref, o_ref, acc_ref):
    k = pl.program_id(2)

    @pl.when(k == 0)
    def _():
        acc_ref[...] = jnp.zeros_like(acc_ref)

    acc_ref[...] += lax.dot_general(
        x_ref[...], w_ref[...],
        dimension_numbers=(((1,), (1,)), ((), ())),   # contract last dims
        preferred_element_type=jnp.float32)

    @pl.when(k == pl.num_programs(2) - 1)
    def _():
        o_ref[...] = (acc_ref[...] + b_ref[...]).astype(o_ref.dtype)


def _linear_cached(x_p, weff_p, bias_p, tb, tn, tk):
    b_p, k_p = x_p.shape
    n_p = weff_p.shape[0]
    grid = (b_p // tb, n_p // tn, k_p // tk)
    return pl.pallas_call(
        _linear_cached_kernel,
        out_shape=jax.ShapeDtypeStruct((b_p, n_p), jnp.float32),
        grid=grid,
        in_specs=[
            pl.BlockSpec((tb, tk), lambda i, j, k: (i, k)),   # x (bf16)
            pl.BlockSpec((tn, tk), lambda i, j, k: (j, k)),   # w_eff (bf16)
            pl.BlockSpec((1, tn), lambda i, j, k: (0, j)),    # bias row
        ],
        out_specs=pl.BlockSpec((tb, tn), lambda i, j, k: (i, j)),
        scratch_shapes=[pltpu.VMEM((tb, tn), jnp.float32)],
        compiler_params=_MM_COMPILER_PARAMS,
        cost_estimate=pl.CostEstimate(
            flops=2 * b_p * n_p * k_p,
            transcendentals=0,
            bytes_accessed=b_p * k_p * 2 + n_p * k_p * 2 + b_p * n_p * 4),
    )(x_p, weff_p, bias_p)


# ------------------------------------------------------------------
# Kernel 3 (uncached path): mask mix fused into the matmul
# ------------------------------------------------------------------
def _linear_fused_kernel(mc_ref, x_ref, w_ref, m_ref, nm_ref, b_ref, o_ref, acc_ref):
    k = pl.program_id(2)

    @pl.when(k == 0)
    def _():
        acc_ref[...] = jnp.zeros_like(acc_ref)

    mc = mc_ref[0, 0]
    m = m_ref[...]
    w_eff = (w_ref[...] * m + (1.0 - m) * mc * nm_ref[...]).astype(jnp.bfloat16)

    acc_ref[...] += lax.dot_general(
        x_ref[...], w_eff,
        dimension_numbers=(((1,), (1,)), ((), ())),
        preferred_element_type=jnp.float32)

    @pl.when(k == pl.num_programs(2) - 1)
    def _():
        o_ref[...] = (acc_ref[...] + b_ref[...]).astype(o_ref.dtype)


def _linear_fused(x_p, weight_p, mask_p, nmask_p, bias_p, mc, tb, tn, tk):
    b_p, k_p = x_p.shape
    n_p = weight_p.shape[0]
    grid = (b_p // tb, n_p // tn, k_p // tk)
    return pl.pallas_call(
        _linear_fused_kernel,
        out_shape=jax.ShapeDtypeStruct((b_p, n_p), jnp.float32),
        grid=grid,
        in_specs=[
            pl.BlockSpec(memory_space=pltpu.MemorySpace.SMEM),    # mask_constant
            pl.BlockSpec((tb, tk), lambda i, j, k: (i, k)),       # x (bf16)
            pl.BlockSpec((tn, tk), lambda i, j, k: (j, k)),       # weight (f32)
            pl.BlockSpec((tn, tk), lambda i, j, k: (j, k)),       # mask (f32)
            pl.BlockSpec((tn, tk), lambda i, j, k: (j, k)),       # normal_mask (f32)
            pl.BlockSpec((1, tn), lambda i, j, k: (0, j)),        # bias row
        ],
        out_specs=pl.BlockSpec((tb, tn), lambda i, j, k: (i, j)),
        scratch_shapes=[pltpu.VMEM((tb, tn), jnp.float32)],
        compiler_params=_MM_COMPILER_PARAMS,
        cost_estimate=pl.CostEstimate(
            flops=2 * b_p * n_p * k_p,
            transcendentals=0,
            bytes_accessed=b_p * k_p * 2 + 3 * n_p * k_p * 4 + b_p * n_p * 4),
    )(mc, x_p, weight_p, mask_p, nmask_p, bias_p)


# ------------------------------------------------------------------
# parameter preparation (padding + cached bf16 w_eff) — done ONCE, not per call
# ------------------------------------------------------------------
def prepare_sparse_linear_params(weight, mask, normal_mask, bias, mask_constant,
                                 *, cache_weff=True):
    out_features, in_features = weight.shape
    in_p = _round_up(in_features, 128)
    out_p = _round_up(out_features, 256)   # 256-aligned N for the 2x256^2 MXU

    if bias is None:
        bias = jnp.zeros((out_features,), dtype=jnp.float32)

    weight_p = _pad2d(jnp.asarray(weight, jnp.float32), out_p, in_p)
    mask_p = _pad2d(jnp.asarray(mask, jnp.float32), out_p, in_p)
    nmask_p = _pad2d(jnp.asarray(normal_mask, jnp.float32), out_p, in_p)
    bias_p = _pad2d(jnp.asarray(bias, jnp.float32).reshape(1, out_features), 1, out_p)
    mc = jnp.full((1, 1), float(mask_constant), dtype=jnp.float32)

    w_eff_p = masked_weight(weight_p, mask_p, nmask_p, mc) if cache_weff else None

    return {
        "weight_p": weight_p, "mask_p": mask_p, "nmask_p": nmask_p,
        "bias_p": bias_p, "mc": mc, "w_eff_p": w_eff_p,
        "in_features": in_features, "out_features": out_features,
        "in_p": in_p, "out_p": out_p,
    }


# ------------------------------------------------------------------
# forward (matches SparseLinear.forward output)
# ------------------------------------------------------------------
def sparse_linear_forward(x, params, *, use_cached=True):
    batch = x.shape[0]
    in_p = params["in_p"]
    out_features = params["out_features"]

    b_p, tb = _batch_tiling(batch)
    tn = 256
    tk = _pick_k_tile(in_p)

    # pad + cast activations once per call (bf16 operands, f32 MXU accumulation)
    x_p = _pad2d(jnp.asarray(x, jnp.float32), b_p, in_p).astype(jnp.bfloat16)

    if use_cached and params["w_eff_p"] is not None:
        y_p = _linear_cached(x_p, params["w_eff_p"], params["bias_p"], tb, tn, tk)
    else:
        y_p = _linear_fused(x_p, params["weight_p"], params["mask_p"],
                            params["nmask_p"], params["bias_p"], params["mc"],
                            tb, tn, tk)
    return y_p[:batch, :out_features]


# ------------------------------------------------------------------
# main: deterministic parameter init + correctness check
# ------------------------------------------------------------------
def _reference(x, weight, mask, normal_mask, bias, mask_constant):
    # pure-JAX reference reproducing the module math with the same bf16 casts
    # the kernel applies to the MXU operands (accumulation stays f32).
    w_eff = weight * mask + (1.0 - mask) * mask_constant * normal_mask
    x_b = x.astype(jnp.bfloat16).astype(jnp.float32)
    w_b = w_eff.astype(jnp.bfloat16).astype(jnp.float32)
    return x_b @ w_b.T + bias[None, :], x @ w_eff.T + bias[None, :]


def _run_case(key, batch, in_features, out_features, mask_constant):
    k_x, k_w, k_b, k_nm = jax.random.split(key, 4)
    x = jax.random.normal(k_x, (batch, in_features), dtype=jnp.float32)

    # kaiming_uniform_(a=sqrt(5)) => U(-1/sqrt(fan_in), 1/sqrt(fan_in))
    bound = 1.0 / math.sqrt(in_features)
    weight = jax.random.uniform(k_w, (out_features, in_features),
                                minval=-bound, maxval=bound, dtype=jnp.float32)
    bias = jax.random.uniform(k_b, (out_features,),
                              minval=-bound, maxval=bound, dtype=jnp.float32)

    # TODO(synk): torch.Generator-seeded RNG parity for normal_mask (and the
    # 'random_subsets' mask type) is not reproducible in JAX; fixed JAX keys
    # are used for the synthetic init instead.
    mask = jnp.asarray(make_mask_densest(in_features, out_features))
    normal_mask = jax.random.normal(k_nm, (out_features, in_features),
                                    dtype=jnp.float32)

    params = prepare_sparse_linear_params(weight, mask, normal_mask, bias,
                                          mask_constant, cache_weff=True)

    y_cached = sparse_linear_forward(x, params, use_cached=True)
    y_fused = sparse_linear_forward(x, params, use_cached=False)
    jax.block_until_ready((y_cached, y_fused))

    y_ref_bf16, y_ref_f32 = _reference(x, weight, mask, normal_mask, bias,
                                       float(mask_constant))

    np.testing.assert_allclose(np.asarray(y_cached), np.asarray(y_ref_bf16),
                               rtol=1e-4, atol=1e-4)
    np.testing.assert_allclose(np.asarray(y_fused), np.asarray(y_ref_bf16),
                               rtol=1e-4, atol=1e-4)
    # sanity vs the full-f32 module math (bf16 operand rounding tolerance)
    np.testing.assert_allclose(np.asarray(y_cached), np.asarray(y_ref_f32),
                               rtol=3e-2, atol=3e-2)


if __name__ == "__main__":
    key = jax.random.PRNGKey(0)
    k1, k2 = jax.random.split(key)

    # small case matching the module's typical tiny layer
    _run_case(k1, batch=8, in_features=32, out_features=16, mask_constant=1.0)
    # slightly larger case exercising multi-step K accumulation and >1 N block
    _run_case(k2, batch=64, in_features=384, out_features=300, mask_constant=0.5)

    print("KERNEL_OK")
</pallas_src>

<mosaic_0001>
module attributes {stable_mosaic.version = 11 : i64} {
  func.func @_mask_mix_kernel(%arg0: i32, %arg1: i32, %arg2: memref<1x1xf32, #tpu.memory_space<smem>>, %arg3: memref<256x128xf32, #tpu.memory_space<vmem>>, %arg4: memref<256x128xf32, #tpu.memory_space<vmem>>, %arg5: memref<256x128xf32, #tpu.memory_space<vmem>>, %arg6: memref<256x128xbf16, #tpu.memory_space<vmem>>) attributes {dimension_semantics = [#tpu.dimension_semantics<parallel>, #tpu.dimension_semantics<parallel>], iteration_bounds = array<i64: 1, 1>, scalar_prefetch = 0 : i64, scratch_operands = 0 : i64, tpu.core_type = #tpu.core_type<tc>, window_params = [{transform_indices = @transform_0, window_bounds = array<i64: 1, 1>}, {transform_indices = @transform_1, window_bounds = array<i64: 256, 128>}, {transform_indices = @transform_2, window_bounds = array<i64: 256, 128>}, {transform_indices = @transform_3, window_bounds = array<i64: 256, 128>}, {transform_indices = @transform_4, window_bounds = array<i64: 256, 128>}]} {
    %c0 = arith.constant 0 : index
    %c0_0 = arith.constant 0 : index
    %0 = memref.load %arg2[%c0, %c0_0] : memref<1x1xf32, #tpu.memory_space<smem>>
    %c0_1 = arith.constant 0 : index
    %c0_2 = arith.constant 0 : index
    %1 = vector.load %arg4[%c0_1, %c0_2] : memref<256x128xf32, #tpu.memory_space<vmem>>, vector<256x128xf32>
    %c0_3 = arith.constant 0 : index
    %c0_4 = arith.constant 0 : index
    %2 = vector.load %arg3[%c0_3, %c0_4] : memref<256x128xf32, #tpu.memory_space<vmem>>, vector<256x128xf32>
    %3 = arith.mulf %2, %1 : vector<256x128xf32>
    %cst = arith.constant 1.000000e+00 : f32
    %4 = vector.broadcast %cst : f32 to vector<256x128xf32>
    %5 = arith.subf %4, %1 : vector<256x128xf32>
    %6 = vector.broadcast %0 : f32 to vector<256x128xf32>
    %7 = arith.mulf %5, %6 : vector<256x128xf32>
    %c0_5 = arith.constant 0 : index
    %c0_6 = arith.constant 0 : index
    %8 = vector.load %arg5[%c0_5, %c0_6] : memref<256x128xf32, #tpu.memory_space<vmem>>, vector<256x128xf32>
    %9 = arith.mulf %7, %8 : vector<256x128xf32>
    %10 = arith.addf %3, %9 : vector<256x128xf32>
    %11 = arith.truncf %10 : vector<256x128xf32> to vector<256x128xbf16>
    %c0_7 = arith.constant 0 : index
    %c0_8 = arith.constant 0 : index
    %12 = vector.load %arg6[%c0_7, %c0_8] : memref<256x128xbf16, #tpu.memory_space<vmem>>, vector<256x128xbf16>
    tpu.vector_store %arg6[%c0_7, %c0_8], %11 {strides = array<i32>} : memref<256x128xbf16, #tpu.memory_space<vmem>>, vector<256x128xbf16>,
    return
  }
  func.func @transform_0(%arg0: i32, %arg1: i32) -> (i32, i32) {
    %c0_i32 = arith.constant 0 : i32
    %c0_i32_0 = arith.constant 0 : i32
    %c0_i32_1 = arith.constant 0 : i32
    return %c0_i32, %c0_i32_0 : i32, i32
  }
  func.func @transform_1(%arg0: i32, %arg1: i32) -> (i32, i32) {
    %c0_i32 = arith.constant 0 : i32
    return %arg0, %arg1 : i32, i32
  }
  func.func @transform_2(%arg0: i32, %arg1: i32) -> (i32, i32) {
    %c0_i32 = arith.constant 0 : i32
    return %arg0, %arg1 : i32, i32
  }
  func.func @transform_3(%arg0: i32, %arg1: i32) -> (i32, i32) {
    %c0_i32 = arith.constant 0 : i32
    return %arg0, %arg1 : i32, i32
  }
  func.func @transform_4(%arg0: i32, %arg1: i32) -> (i32, i32) {
    %c0_i32 = arith.constant 0 : i32
    return %arg0, %arg1 : i32, i32
  }
}

</mosaic_0001>

<bundles_post_ra>
// kernel: tpu_custom_call.1
= control target key start
LH: loop header
LB: loop body
LE: loop exit
PB: predicated region body
PF: predicated region fallthrough
CT: control target
= control target key end

     0   :  { %10 = vsyncpa [#allocation4], 0  ;;  %s891_s0 = inlined_call_operand.<no memory space> [shape: f32[1,1], index: 0, kind: input, shape index: {}]   ;;  %s892_s1 = inlined_call_operand.hbm [shape: f32[256,128], index: 1, kind: input, shape index: {}]   ;;  %s893_s2 = inlined_call_operand.hbm [shape: f32[256,128], index: 2, kind: input, shape index: {}]   ;;  %s894_s3 = inlined_call_operand.hbm [shape: f32[256,128], index: 3, kind: input, shape index: {}]   ;;  %s895_s4 = inlined_call_operand.hbm [shape: bf16[256,128], index: 4, kind: output, shape index: {}]  }
   0x1   :  { %11 = vsyncpa [#allocation7], 0 }
   0x2   :  { %12 = vsyncpa [#allocation5], 0  ;;  %s757_s15 = smov [#allocation6]   ;;  %s758_s17 = smov [#allocation3]  }
   0x3   :  { %s32_s16 = sshll.u32 %s757_s15, 4  ;;  %s20_s18 = sshll.u32 %s758_s17, 4  ;;  %s33_s16 = int_to_ptr.vmem [resolvable:$true] %s32_s16  ;;  %s790_s18 = int_to_ptr.vmem [resolvable:$true] %s20_s18 }
   0x4   :  { %s663_s21 = scalar_lea.hbm %s893_s2, 4096 }
   0x5   :  { %p664_p0 = scmp.ne.s32.totalorder %s893_s2, %s663_s21  ;;  %p667_p1 = scmp.lt.u32.totalorder %s663_s21, %s893_s2 }
   0x7   :  { %p669_p2 = pnand %p667_p1, %p664_p0 }
   0x9   :  { %672 = shalt.err (!%p669_p2)
}
   0xa   :  { %s673_s26 = scalar_lea.vmem %s33_s16, 4096  ;;  %p678_p4 = scmp.lt.s32.totalorder %s33_s16, %s33_s16 }
   0xb   :  { %p674_p3 = scmp.ne.s32.totalorder %s33_s16, %s673_s26  ;;  %p679_p5 = scmp.lt.s32.totalorder %s673_s26, %s673_s26 }
   0xd   :  { %p680_p6 = por %p679_p5, %p678_p4 }
   0xf   :  { %p681_p7 = pnand %p680_p6, %p674_p3 }
  0x11   :  { %684 = shalt.err (!%p681_p7)
}
  0x12   :  { %s759_s27 = smov 128   ;;  %s760_s28 = smov 8  }
  0x13   :  { %38 = dma.hbm_to_vmem [thread:$0]  %s893_s2, 4096, %s33_s16, [#allocation7], %s759_s27, %s759_s27, %s760_s28  }
  0x14   :  { %s685_s7 = scalar_lea.hbm %s892_s1, 4096 }
  0x15   :  { %p686_p8 = scmp.ne.s32.totalorder %s892_s1, %s685_s7  ;;  %p689_p9 = scmp.lt.u32.totalorder %s685_s7, %s892_s1 }
  0x17   :  { %p691_p10 = pnand %p689_p9, %p686_p8 }
  0x19   :  { %694 = shalt.err (!%p691_p10)
}
  0x1a   :  { %s695_s12 = scalar_lea.vmem %s790_s18, 4096  ;;  %p700_p12 = scmp.lt.s32.totalorder %s790_s18, %s790_s18 }
  0x1b   :  { %p696_p11 = scmp.ne.s32.totalorder %s790_s18, %s695_s12  ;;  %p701_p13 = scmp.lt.s32.totalorder %s695_s12, %s695_s12 }
  0x1d   :  { %p702_p0 = por %p701_p13, %p700_p12 }
  0x1f   :  { %p703_p1 = pnand %p702_p0, %p696_p11 }
  0x21   :  { %706 = shalt.err (!%p703_p1)
}
  0x22   :  { %26 = dma.hbm_to_vmem [thread:$0]  %s892_s1, 4096, %s790_s18, [#allocation4], %s759_s27, %s759_s27, %s760_s28  }
  0x23   :  { %s761_s14 = smov [#allocation8]   ;;  %s707_s19 = scalar_lea.hbm %s894_s3, 4096 }
  0x24   :  { %s44_s15 = sshll.u32 %s761_s14, 4  ;;  %p708_p2 = scmp.ne.s32.totalorder %s894_s3, %s707_s19  ;;  %s45_s15 = int_to_ptr.vmem [resolvable:$true] %s44_s15 }
  0x25   :  { %p711_p3 = scmp.lt.u32.totalorder %s707_s19, %s894_s3 }
  0x27   :  { %p713_p4 = pnand %p711_p3, %p708_p2 }
  0x29   :  { %716 = shalt.err (!%p713_p4)
}
  0x2a   :  { %s717_s24 = scalar_lea.vmem %s45_s15, 4096  ;;  %p722_p6 = scmp.lt.s32.totalorder %s45_s15, %s45_s15 }
  0x2b   :  { %p718_p5 = scmp.ne.s32.totalorder %s45_s15, %s717_s24  ;;  %p723_p7 = scmp.lt.s32.totalorder %s717_s24, %s717_s24 }
  0x2d   :  { %p724_p8 = por %p723_p7, %p722_p6 }
  0x2f   :  { %p725_p9 = pnand %p724_p8, %p718_p5 }
  0x31   :  { %728 = shalt.err (!%p725_p9)
}
  0x32   :  { %50 = dma.hbm_to_vmem [thread:$0]  %s894_s3, 4096, %s45_s15, [#allocation7], %s759_s27, %s759_s27, %s760_s28  }
  0x33   :  { %751 = dma.done.wait [#allocation4], 4096  }
  0x34   :  { %752 = vsyncadd [#allocation4], 4294963200 }
  0x35   :  { %753 = dma.done.wait [#allocation7], 8192  }
  0x36   :  { %754 = vsyncadd [#allocation7], 4294959104  ;;  %v61_v0 = vld [vmem:[#allocation6] sm:$0xff]  ;;  %v62_v1 = vld [vmem:[#allocation6 + $0x8] sm:$0xff]  ;;  %v845_v3 = vstv %s891_s0  ;;  %s762_s0 = smov [#allocation9]  }
  0x37   :  { %v93_v2 = vld [vmem:[#allocation3] sm:$0xff]  ;;  %v94_v4 = vld [vmem:[#allocation3 + $0x8] sm:$0xff]  ;;  %v157_v5 = vsub.f32 1.0, %v61_v0  ;;  %v158_v6 = vsub.f32 1.0, %v62_v1  ;;  %v63_v10 = vld [vmem:[#allocation6 + $0x10] sm:$0xff]  ;;  %s483_s3 = sshll.u32 %s762_s0, 4  ;;  %s484_s3 = int_to_ptr.vmem [resolvable:$true] %s483_s3 }
  0x38   :  { %v222_v7 = vld [vmem:[#allocation8] sm:$0xff]  ;;  %v223_v8 = vld [vmem:[#allocation8 + $0x8] sm:$0xff]  ;;  %v125_v9 = vmul.f32 %v93_v2, %v61_v0  ;;  %v64_v11 = vld [vmem:[#allocation6 + $0x18] sm:$0xff]  ;;  %v126_v13 = vmul.f32 %v94_v4, %v62_v1  ;;  %v159_v17 = vsub.f32 1.0, %v63_v10  ;;  %s729_s27 = scalar_lea.vmem %s484_s3, 2048  ;;  %p734_p11 = scmp.lt.s32.totalorder %s484_s3, %s484_s3 }
  0x39   :  { %v95_v12 = vld [vmem:[#allocation3 + $0x10] sm:$0xff]  ;;  %v190_v14 = vmul.f32 %v845_v3, %v157_v5  ;;  %v191_v15 = vmul.f32 %v845_v3, %v158_v6  ;;  %v96_v16 = vld [vmem:[#allocation3 + $0x18] sm:$0xff]  ;;  %v160_v19 = vsub.f32 1.0, %v64_v11  ;;  %v65_v20 = vld [vmem:[#allocation6 + $0x20] sm:$0xff]  ;;  %p730_p10 = scmp.ne.s32.totalorder %s484_s3, %s729_s27  ;;  %p735_p12 = scmp.lt.s32.totalorder %s729_s27, %s729_s27 }
  0x3a   :  { %v224_v18 = vld [vmem:[#allocation8 + $0x10] sm:$0xff]  ;;  %v66_v21 = vld [vmem:[#allocation6 + $0x28] sm:$0xff]  ;;  %v97_v22 = vld [vmem:[#allocation3 + $0x20] sm:$0xff]  ;;  %v127_v25 = vmul.f32 %v95_v12, %v63_v10  ;;  %v192_v26 = vmul.f32 %v845_v3, %v159_v17  ;;  %v128_v29 = vmul.f32 %v96_v16, %v64_v11  ;;  %v161_v31 = vsub.f32 1.0, %v65_v20 }
  0x3b   :  { %v254_v23 = vmul.f32 %v222_v7, %v190_v14  ;;  %v255_v24 = vmul.f32 %v223_v8, %v191_v15  ;;  %v225_v27 = vld [vmem:[#allocation8 + $0x18] sm:$0xff]  ;;  %v98_v28 = vld [vmem:[#allocation3 + $0x28] sm:$0xff]  ;;  %v193_v30 = vmul.f32 %v845_v3, %v160_v19  ;;  %v162_v32 = vsub.f32 1.0, %v66_v21  ;;  %v67_v33 = vld [vmem:[#allocation6 + $0x30] sm:$0xff]  ;;  %p736_p13 = por %p735_p12, %p734_p11 }
  0x3c   :  { %v68_v34 = vld [vmem:[#allocation6 + $0x38] sm:$0xff]  ;;  %v256_v37 = vmul.f32 %v224_v18, %v192_v26  ;;  %v129_v38 = vmul.f32 %v97_v22, %v65_v20  ;;  %v226_v39 = vld [vmem:[#allocation8 + $0x20] sm:$0xff]  ;;  %v227_v40 = vld [vmem:[#allocation8 + $0x28] sm:$0xff]  ;;  %v130_v43 = vmul.f32 %v98_v28, %v66_v21  ;;  %v194_v44 = vmul.f32 %v845_v3, %v161_v31 }
  0x3d   :  { %v286_v35 = vadd.f32 %v254_v23, %v125_v9  ;;  %v287_v36 = vadd.f32 %v255_v24, %v126_v13  ;;  %v99_v41 = vld [vmem:[#allocation3 + $0x30] sm:$0xff]  ;;  %v257_v42 = vmul.f32 %v225_v27, %v193_v30  ;;  %v195_v45 = vmul.f32 %v845_v3, %v162_v32  ;;  %v100_v46 = vld [vmem:[#allocation3 + $0x38] sm:$0xff]  ;;  %v69_v47 = vld [vmem:[#allocation6 + $0x40] sm:$0xff]  ;;  %p737_p0 = pnand %p736_p13, %p730_p10 }
  0x3e   :  { %v288_v49 = vadd.f32 %v256_v37, %v127_v25  ;;  %v163_v50 = vsub.f32 1.0, %v67_v33  ;;  %v164_v51 = vsub.f32 1.0, %v68_v34  ;;  %v70_v52 = vld [vmem:[#allocation6 + $0x48] sm:$0xff]  ;;  %v258_v54 = vmul.f32 %v226_v39, %v194_v44  ;;  %v228_v57 = vld [vmem:[#allocation8 + $0x30] sm:$0xff]  ;;  %v229_v58 = vld [vmem:[#allocation8 + $0x38] sm:$0xff] }
  0x3f   :  { %v563_v48 = vpack.c.bf16 %v287_v36, %v286_v35  ;;  %v289_v53 = vadd.f32 %v257_v42, %v128_v29  ;;  %v259_v55 = vmul.f32 %v227_v40, %v195_v45  ;;  %v131_v56 = vmul.f32 %v99_v41, %v67_v33  ;;  %v101_v59 = vld [vmem:[#allocation3 + $0x40] sm:$0xff]  ;;  %v102_v63 = vld [vmem:[#allocation3 + $0x48] sm:$0xff]  ;;  %v71_v1 = vld [vmem:[#allocation6 + $0x50] sm:$0xff] }
  0x40   :  { %v132_v60 = vmul.f32 %v100_v46, %v68_v34  ;;  %v196_v61 = vmul.f32 %v845_v3, %v163_v50  ;;  %v197_v62 = vmul.f32 %v845_v3, %v164_v51  ;;  %v165_v0 = vsub.f32 1.0, %v69_v47  ;;  %v230_v7 = vld [vmem:[#allocation8 + $0x40] sm:$0xff]  ;;  %v72_v8 = vld [vmem:[#allocation6 + $0x58] sm:$0xff]  ;;  %v231_v13 = vld [vmem:[#allocation8 + $0x48] sm:$0xff] }
  0x41   :  { %564 = vst [vmem:[#allocation9] sm:$0xff] %v563_v48   ;;  %v568_v2 = vpack.c.bf16 %v289_v53, %v288_v49  ;;  %v290_v4 = vadd.f32 %v258_v54, %v129_v38  ;;  %v291_v5 = vadd.f32 %v259_v55, %v130_v43  ;;  %v166_v6 = vsub.f32 1.0, %v70_v52  ;;  %v103_v14 = vld [vmem:[#allocation3 + $0x50] sm:$0xff]  ;;  %v104_v15 = vld [vmem:[#allocation3 + $0x58] sm:$0xff]  ;;  %v73_v20 = vld [vmem:[#allocation6 + $0x60] sm:$0xff] }
  0x42   :  { %v260_v9 = vmul.f32 %v228_v57, %v196_v61  ;;  %v261_v10 = vmul.f32 %v229_v58, %v197_v62  ;;  %v133_v11 = vmul.f32 %v101_v59, %v69_v47  ;;  %v198_v12 = vmul.f32 %v845_v3, %v165_v0  ;;  %v232_v25 = vld [vmem:[#allocation8 + $0x50] sm:$0xff]  ;;  %v74_v26 = vld [vmem:[#allocation6 + $0x68] sm:$0xff]  ;;  %v105_v27 = vld [vmem:[#allocation3 + $0x60] sm:$0xff] }
  0x43   :  { %640 = vst [vmem:[#allocation9 + $0x8] sm:$0xff] %v568_v2   ;;  %v573_v16 = vpack.c.bf16 %v291_v5, %v290_v4  ;;  %v134_v17 = vmul.f32 %v102_v63, %v70_v52  ;;  %v199_v18 = vmul.f32 %v845_v3, %v166_v6  ;;  %v167_v19 = vsub.f32 1.0, %v71_v1  ;;  %v233_v32 = vld [vmem:[#allocation8 + $0x58] sm:$0xff]  ;;  %v106_v33 = vld [vmem:[#allocation3 + $0x68] sm:$0xff]  ;;  %v75_v34 = vld [vmem:[#allocation6 + $0x70] sm:$0xff] }
  0x44   :  { %v292_v21 = vadd.f32 %v260_v9, %v131_v56  ;;  %v293_v22 = vadd.f32 %v261_v10, %v132_v60  ;;  %v262_v23 = vmul.f32 %v230_v7, %v198_v12  ;;  %v168_v24 = vsub.f32 1.0, %v72_v8  ;;  %v76_v39 = vld [vmem:[#allocation6 + $0x78] sm:$0xff]  ;;  %v234_v44 = vld [vmem:[#allocation8 + $0x60] sm:$0xff]  ;;  %v107_v45 = vld [vmem:[#allocation3 + $0x70] sm:$0xff] }
  0x45   :  { %641 = vst [vmem:[#allocation9 + $0x10] sm:$0xff] %v573_v16   ;;  %v263_v28 = vmul.f32 %v231_v13, %v199_v18  ;;  %v135_v29 = vmul.f32 %v103_v14, %v71_v1  ;;  %v136_v30 = vmul.f32 %v104_v15, %v72_v8  ;;  %v200_v31 = vmul.f32 %v845_v3, %v167_v19  ;;  %v235_v49 = vld [vmem:[#allocation8 + $0x68] sm:$0xff]  ;;  %v108_v50 = vld [vmem:[#allocation3 + $0x78] sm:$0xff]  ;;  %v77_v52 = vld [vmem:[#allocation6 + $0x80] sm:$0xff] }
  0x46   :  { %v578_v35 = vpack.c.bf16 %v293_v22, %v292_v21  ;;  %v294_v36 = vadd.f32 %v262_v23, %v133_v11  ;;  %v201_v37 = vmul.f32 %v845_v3, %v168_v24  ;;  %v169_v38 = vsub.f32 1.0, %v73_v20  ;;  %v236_v57 = vld [vmem:[#allocation8 + $0x70] sm:$0xff]  ;;  %v78_v58 = vld [vmem:[#allocation6 + $0x88] sm:$0xff]  ;;  %v237_v63 = vld [vmem:[#allocation8 + $0x78] sm:$0xff] }
  0x47   :  { %v295_v40 = vadd.f32 %v263_v28, %v134_v17  ;;  %v264_v41 = vmul.f32 %v232_v25, %v200_v31  ;;  %v137_v42 = vmul.f32 %v105_v27, %v73_v20  ;;  %v170_v43 = vsub.f32 1.0, %v74_v26  ;;  %v109_v0 = vld [vmem:[#allocation3 + $0x80] sm:$0xff]  ;;  %v110_v5 = vld [vmem:[#allocation3 + $0x88] sm:$0xff]  ;;  %v79_v7 = vld [vmem:[#allocation6 + $0x90] sm:$0xff] }
  0x48   :  { %642 = vst [vmem:[#allocation9 + $0x18] sm:$0xff] %v578_v35   ;;  %v265_v46 = vmul.f32 %v233_v32, %v201_v37  ;;  %v138_v47 = vmul.f32 %v106_v33, %v74_v26  ;;  %v202_v48 = vmul.f32 %v845_v3, %v169_v38  ;;  %v171_v51 = vsub.f32 1.0, %v75_v34  ;;  %v238_v12 = vld [vmem:[#allocation8 + $0x80] sm:$0xff]  ;;  %v80_v13 = vld [vmem:[#allocation6 + $0x98] sm:$0xff]  ;;  %v239_v18 = vld [vmem:[#allocation8 + $0x88] sm:$0xff] }
  0x49   :  { %v583_v53 = vpack.c.bf16 %v295_v40, %v294_v36  ;;  %v296_v54 = vadd.f32 %v264_v41, %v135_v29  ;;  %v203_v55 = vmul.f32 %v845_v3, %v170_v43  ;;  %v172_v56 = vsub.f32 1.0, %v76_v39  ;;  %v111_v19 = vld [vmem:[#allocation3 + $0x90] sm:$0xff]  ;;  %v112_v20 = vld [vmem:[#allocation3 + $0x98] sm:$0xff]  ;;  %v81_v25 = vld [vmem:[#allocation6 + $0xa0] sm:$0xff] }
  0x4a   :  { %v297_v59 = vadd.f32 %v265_v46, %v136_v30  ;;  %v266_v60 = vmul.f32 %v234_v44, %v202_v48  ;;  %v139_v61 = vmul.f32 %v107_v45, %v75_v34  ;;  %v204_v62 = vmul.f32 %v845_v3, %v171_v51  ;;  %v240_v30 = vld [vmem:[#allocation8 + $0x90] sm:$0xff]  ;;  %v82_v31 = vld [vmem:[#allocation6 + $0xa8] sm:$0xff]  ;;  %v113_v32 = vld [vmem:[#allocation3 + $0xa0] sm:$0xff] }
  0x4b   :  { %643 = vst [vmem:[#allocation9 + $0x20] sm:$0xff] %v583_v53   ;;  %v267_v1 = vmul.f32 %v235_v49, %v203_v55  ;;  %v140_v2 = vmul.f32 %v108_v50, %v76_v39  ;;  %v205_v4 = vmul.f32 %v845_v3, %v172_v56  ;;  %v173_v6 = vsub.f32 1.0, %v77_v52  ;;  %v241_v37 = vld [vmem:[#allocation8 + $0x98] sm:$0xff]  ;;  %v114_v38 = vld [vmem:[#allocation3 + $0xa8] sm:$0xff]  ;;  %v83_v39 = vld [vmem:[#allocation6 + $0xb0] sm:$0xff] }
  0x4c   :  { %v588_v8 = vpack.c.bf16 %v297_v59, %v296_v54  ;;  %v298_v9 = vadd.f32 %v266_v60, %v137_v42  ;;  %v268_v10 = vmul.f32 %v236_v57, %v204_v62  ;;  %v174_v11 = vsub.f32 1.0, %v78_v58  ;;  %v84_v44 = vld [vmem:[#allocation6 + $0xb8] sm:$0xff]  ;;  %v242_v49 = vld [vmem:[#allocation8 + $0xa0] sm:$0xff]  ;;  %v115_v50 = vld [vmem:[#allocation3 + $0xb0] sm:$0xff] }
  0x4d   :  { %v299_v14 = vadd.f32 %v267_v1, %v138_v47  ;;  %v269_v15 = vmul.f32 %v237_v63, %v205_v4  ;;  %v141_v16 = vmul.f32 %v109_v0, %v77_v52  ;;  %v206_v17 = vmul.f32 %v845_v3, %v173_v6  ;;  %v243_v54 = vld [vmem:[#allocation8 + $0xa8] sm:$0xff]  ;;  %v116_v55 = vld [vmem:[#allocation3 + $0xb8] sm:$0xff]  ;;  %v85_v57 = vld [vmem:[#allocation6 + $0xc0] sm:$0xff] }
  0x4e   :  { %644 = vst [vmem:[#allocation9 + $0x28] sm:$0xff] %v588_v8   ;;  %v300_v21 = vadd.f32 %v268_v10, %v139_v61  ;;  %v142_v22 = vmul.f32 %v110_v5, %v78_v58  ;;  %v207_v23 = vmul.f32 %v845_v3, %v174_v11  ;;  %v175_v24 = vsub.f32 1.0, %v79_v7  ;;  %v244_v62 = vld [vmem:[#allocation8 + $0xb0] sm:$0xff]  ;;  %v86_v63 = vld [vmem:[#allocation6 + $0xc8] sm:$0xff]  ;;  %v245_v5 = vld [vmem:[#allocation8 + $0xb8] sm:$0xff] }
  0x4f   :  { %v593_v26 = vpack.c.bf16 %v299_v14, %v298_v9  ;;  %v301_v27 = vadd.f32 %v269_v15, %v140_v2  ;;  %v270_v28 = vmul.f32 %v238_v12, %v206_v17  ;;  %v176_v29 = vsub.f32 1.0, %v80_v13  ;;  %v117_v6 = vld [vmem:[#allocation3 + $0xc0] sm:$0xff]  ;;  %v118_v10 = vld [vmem:[#allocation3 + $0xc8] sm:$0xff]  ;;  %v87_v12 = vld [vmem:[#allocation6 + $0xd0] sm:$0xff] }
  0x50   :  { %v271_v33 = vmul.f32 %v239_v18, %v207_v23  ;;  %v143_v34 = vmul.f32 %v111_v19, %v79_v7  ;;  %v144_v35 = vmul.f32 %v112_v20, %v80_v13  ;;  %v208_v36 = vmul.f32 %v845_v3, %v175_v24  ;;  %v246_v17 = vld [vmem:[#allocation8 + $0xc0] sm:$0xff]  ;;  %v88_v18 = vld [vmem:[#allocation6 + $0xd8] sm:$0xff]  ;;  %v247_v23 = vld [vmem:[#allocation8 + $0xc8] sm:$0xff] }
  0x51   :  { %645 = vst [vmem:[#allocation9 + $0x30] sm:$0xff] %v593_v26   ;;  %v598_v40 = vpack.c.bf16 %v301_v27, %v300_v21  ;;  %v302_v41 = vadd.f32 %v270_v28, %v141_v16  ;;  %v209_v42 = vmul.f32 %v845_v3, %v176_v29  ;;  %v177_v43 = vsub.f32 1.0, %v81_v25  ;;  %v119_v24 = vld [vmem:[#allocation3 + $0xd0] sm:$0xff] }
  0x52   :  { %v303_v45 = vadd.f32 %v271_v33, %v142_v22  ;;  %v272_v46 = vmul.f32 %v240_v30, %v208_v36  ;;  %v145_v47 = vmul.f32 %v113_v32, %v81_v25  ;;  %v178_v48 = vsub.f32 1.0, %v82_v31  ;;  %v120_v25 = vld [vmem:[#allocation3 + $0xd8] sm:$0xff]  ;;  %v89_v30 = vld [vmem:[#allocation6 + $0xe0] sm:$0xff]  ;;  %v90_v36 = vld [vmem:[#allocation6 + $0xe8] sm:$0xff] }
  0x53   :  { %646 = vst [vmem:[#allocation9 + $0x38] sm:$0xff] %v598_v40   ;;  %v273_v51 = vmul.f32 %v241_v37, %v209_v42  ;;  %v146_v52 = vmul.f32 %v114_v38, %v82_v31  ;;  %v210_v53 = vmul.f32 %v845_v3, %v177_v43  ;;  %v179_v56 = vsub.f32 1.0, %v83_v39  ;;  %v121_v37 = vld [vmem:[#allocation3 + $0xe0] sm:$0xff]  ;;  %v249_v42 = vld [vmem:[#allocation8 + $0xd8] sm:$0xff]  ;;  %v122_v43 = vld [vmem:[#allocation3 + $0xe8] sm:$0xff] }
  0x54   :  { %v603_v58 = vpack.c.bf16 %v303_v45, %v302_v41  ;;  %v304_v59 = vadd.f32 %v272_v46, %v143_v34  ;;  %v211_v60 = vmul.f32 %v845_v3, %v178_v48  ;;  %v180_v61 = vsub.f32 1.0, %v84_v44 }
  0x55   :  { %v305_v0 = vadd.f32 %v273_v51, %v144_v35  ;;  %v274_v1 = vmul.f32 %v242_v49, %v210_v53  ;;  %v147_v2 = vmul.f32 %v115_v50, %v83_v39  ;;  %v212_v4 = vmul.f32 %v845_v3, %v179_v56  ;;  %v248_v35 = vld [vmem:[#allocation8 + $0xd0] sm:$0xff]  ;;  %v92_v49 = vld [vmem:[#allocation6 + $0xf8] sm:$0xff] }
  0x56   :  { %647 = vst [vmem:[#allocation9 + $0x40] sm:$0xff] %v603_v58   ;;  %v275_v7 = vmul.f32 %v243_v54, %v211_v60  ;;  %v148_v8 = vmul.f32 %v116_v55, %v84_v44  ;;  %v213_v9 = vmul.f32 %v845_v3, %v180_v61  ;;  %v181_v11 = vsub.f32 1.0, %v85_v57  ;;  %v91_v44 = vld [vmem:[#allocation6 + $0xf0] sm:$0xff]  ;;  %v250_v54 = vld [vmem:[#allocation8 + $0xe0] sm:$0xff]  ;;  %v124_v60 = vld [vmem:[#allocation3 + $0xf8] sm:$0xff] }
  0x57   :  { %v608_v13 = vpack.c.bf16 %v305_v0, %v304_v59  ;;  %v306_v14 = vadd.f32 %v274_v1, %v145_v47  ;;  %v276_v15 = vmul.f32 %v244_v62, %v212_v4  ;;  %v182_v16 = vsub.f32 1.0, %v86_v63  ;;  %v123_v55 = vld [vmem:[#allocation3 + $0xf0] sm:$0xff]  ;;  %v251_v59 = vld [vmem:[#allocation8 + $0xe8] sm:$0xff] }
  0x58   :  { %v307_v19 = vadd.f32 %v275_v7, %v146_v52  ;;  %v277_v20 = vmul.f32 %v245_v5, %v213_v9  ;;  %v149_v21 = vmul.f32 %v117_v6, %v85_v57  ;;  %v214_v22 = vmul.f32 %v845_v3, %v181_v11 }
  0x59   :  { %648 = vst [vmem:[#allocation9 + $0x48] sm:$0xff] %v608_v13   ;;  %v308_v26 = vadd.f32 %v276_v15, %v147_v2  ;;  %v150_v27 = vmul.f32 %v118_v10, %v86_v63  ;;  %v215_v28 = vmul.f32 %v845_v3, %v182_v16  ;;  %v183_v29 = vsub.f32 1.0, %v87_v12  ;;  %v252_v2 = vld [vmem:[#allocation8 + $0xf0] sm:$0xff] }
  0x5a   :  { %v613_v31 = vpack.c.bf16 %v307_v19, %v306_v14  ;;  %v309_v32 = vadd.f32 %v277_v20, %v148_v8  ;;  %v278_v33 = vmul.f32 %v246_v17, %v214_v22  ;;  %v184_v34 = vsub.f32 1.0, %v88_v18  ;;  %v253_v8 = vld [vmem:[#allocation8 + $0xf8] sm:$0xff] }
  0x5b   :  { %v279_v38 = vmul.f32 %v247_v23, %v215_v28  ;;  %v151_v39 = vmul.f32 %v119_v24, %v87_v12  ;;  %v152_v40 = vmul.f32 %v120_v25, %v88_v18  ;;  %v216_v41 = vmul.f32 %v845_v3, %v183_v29 }
  0x5c   :  { %649 = vst [vmem:[#allocation9 + $0x50] sm:$0xff] %v613_v31   ;;  %v618_v45 = vpack.c.bf16 %v309_v32, %v308_v26  ;;  %v310_v46 = vadd.f32 %v278_v33, %v149_v21  ;;  %v217_v47 = vmul.f32 %v845_v3, %v184_v34  ;;  %v185_v48 = vsub.f32 1.0, %v89_v30 }
  0x5d   :  { %v311_v50 = vadd.f32 %v279_v38, %v150_v27  ;;  %v280_v51 = vmul.f32 %v248_v35, %v216_v41  ;;  %v153_v52 = vmul.f32 %v121_v37, %v89_v30  ;;  %v186_v53 = vsub.f32 1.0, %v90_v36 }
  0x5e   :  { %650 = vst [vmem:[#allocation9 + $0x58] sm:$0xff] %v618_v45   ;;  %v281_v56 = vmul.f32 %v249_v42, %v217_v47  ;;  %v154_v57 = vmul.f32 %v122_v43, %v90_v36  ;;  %v218_v58 = vmul.f32 %v845_v3, %v185_v48  ;;  %v187_v61 = vsub.f32 1.0, %v91_v44 }
  0x5f   :  { %v623_v62 = vpack.c.bf16 %v311_v50, %v310_v46  ;;  %v312_v63 = vadd.f32 %v280_v51, %v151_v39  ;;  %v219_v0 = vmul.f32 %v845_v3, %v186_v53  ;;  %v188_v1 = vsub.f32 1.0, %v92_v49 }
  0x60   :  { %v313_v4 = vadd.f32 %v281_v56, %v152_v40  ;;  %v282_v5 = vmul.f32 %v250_v54, %v218_v58  ;;  %v155_v6 = vmul.f32 %v123_v55, %v91_v44  ;;  %v220_v7 = vmul.f32 %v845_v3, %v187_v61 }
  0x61   :  { %651 = vst [vmem:[#allocation9 + $0x60] sm:$0xff] %v623_v62   ;;  %v283_v9 = vmul.f32 %v251_v59, %v219_v0  ;;  %v156_v10 = vmul.f32 %v124_v60, %v92_v49  ;;  %v221_v11 = vmul.f32 %v845_v3, %v188_v1 }
  0x62   :  { %v628_v12 = vpack.c.bf16 %v313_v4, %v312_v63  ;;  %v314_v13 = vadd.f32 %v282_v5, %v153_v52  ;;  %v284_v14 = vmul.f32 %v252_v2, %v220_v7 }
  0x63   :  { %v315_v15 = vadd.f32 %v283_v9, %v154_v57  ;;  %v285_v16 = vmul.f32 %v253_v8, %v221_v11 }
  0x64   :  { %652 = vst [vmem:[#allocation9 + $0x68] sm:$0xff] %v628_v12   ;;  %v316_v17 = vadd.f32 %v284_v14, %v155_v6 }
  0x65   :  { %v633_v18 = vpack.c.bf16 %v315_v15, %v314_v13  ;;  %v317_v19 = vadd.f32 %v285_v16, %v156_v10 }
  0x67   :  { %653 = vst [vmem:[#allocation9 + $0x70] sm:$0xff] %v633_v18   ;;  %v638_v20 = vpack.c.bf16 %v317_v19, %v316_v17 }
  0x69   :  { %654 = vst [vmem:[#allocation9 + $0x78] sm:$0xff] %v638_v20  }
  0x6a   :  { %740 = shalt.err (!%p737_p0)
}
  0x6b   :  { %s741_s30 = scalar_lea.hbm %s895_s4, 2048 }
  0x6c   :  { %p742_p1 = scmp.ne.s32.totalorder %s895_s4, %s741_s30  ;;  %p745_p2 = scmp.lt.u32.totalorder %s741_s30, %s895_s4 }
  0x6e   :  { %p747_p3 = pnand %p745_p2, %p742_p1 }
  0x70   :  { %750 = shalt.err (!%p747_p3)
}
  0x71   :  { %s763_s9 = smov 64   ;;  %s764_s10 = smov 4  }
  0x72   :  { %489 = dma.vmem_to_hbm [thread:$0]  %s484_s3, 2048, %s895_s4, [#allocation5], %s763_s9, %s763_s9, %s764_s10  }
  0x73   :  { %755 = dma.done.wait [#allocation5], 2048  }
  0x74   :  { %756 = vsyncadd [#allocation5], 4294965248 }
  0x75   :  { %493 = vsyncpa [#allocation4], 1 }
  0x76   :  { %494 = vsyncpa [#allocation7], 1 }
  0x77   :  { %495 = vsyncpa [#allocation5], 1 }

</bundles_post_ra>
